<compile_context>
chip_gen: v6e
topology: v6e:2x2x1
jax: 0.10.0
libtpu: 0.0.40
codegen_flags: <defaults>
</compile_context>

<pallas_src>
import functools

import jax
import jax.numpy as jnp
from jax.experimental import pallas as pl
from jax.experimental.pallas import tpu as pltpu

TEMPERATURE = 0.1
_INV_TEMPERATURE = 1.0 / TEMPERATURE


def _itloss_kernel(feat_ref, protoT_ref, logits_ref, labels_ref, out_ref, *,
                   num_class, n_rows, tile_n):
    feat = feat_ref[...]                           # [tn, D]  NATIVE dtype (bf16 stays bf16)
    protoT = protoT_ref[...]                       # [D, P]   same dtype as features
    lg = logits_ref[...].astype(jnp.float32)       # [tn, C]  small; CE math in f32
    lbl = labels_ref[...]                          # [tn, 1]  int32

    tn = feat.shape[0]
    p = protoT.shape[1]
    c = lg.shape[1]

    # Row-validity mask for the ragged last tile (no wrapper-side jnp.pad copies).
    row = jax.lax.broadcasted_iota(jnp.int32, (tn, 1), 0)
    valid = (pl.program_id(0) * tile_n + row) < n_rows                 # [tn, 1] bool

    # features @ prototypes.T on the MXU, f32 accumulate; only [tn,P] result is f32.
    dots = jnp.dot(feat, protoT, preferred_element_type=jnp.float32)   # [tn, P]
    # Zero out-of-bounds (garbage) rows BEFORE any exp/log so they can't make inf/NaN.
    dots = jnp.where(valid, dots, 0.0)
    lg = jnp.where(valid, lg, 0.0)

    # Shared row max for both logsumexps over dots (1/T > 0, so max commutes with scale).
    m2 = jnp.max(dots, axis=1, keepdims=True)                          # [tn, 1]

    # --- supervised-contrastive numerator: sum(mask * log_softmax(dots / T)) ---
    shifted = (dots - m2) * _INV_TEMPERATURE
    log_prob = shifted - jnp.log(jnp.sum(jnp.exp(shifted), axis=1, keepdims=True))
    proxy = jax.lax.broadcasted_iota(jnp.int32, (tn, p), 1)
    sim_part = jnp.sum(jnp.where(valid & (lbl == proxy), log_prob, 0.0))

    # --- jigsaw separation: logsumexp over un-scaled dots, rows with label == num_class ---
    lse = jnp.log(jnp.sum(jnp.exp(dots - m2), axis=1, keepdims=True)) + m2
    sep_part = jnp.sum(jnp.where(valid & (lbl == num_class), lse, 0.0))

    # --- cross entropy (one-hot built in-kernel; select instead of cast*mul) ---
    lg_max = jnp.max(lg, axis=1, keepdims=True)
    lg_shift = lg - lg_max
    logz = jnp.log(jnp.sum(jnp.exp(lg_shift), axis=1, keepdims=True))
    cls = jax.lax.broadcasted_iota(jnp.int32, (tn, c), 1)
    ce_part = -jnp.sum(jnp.where(valid & (lbl == cls), lg_shift - logz, 0.0))

    # --- lane-dense per-tile partial-sum slab: flat indices 0/1/2 carry sim/sep/ce ---
    slab_row = jax.lax.broadcasted_iota(jnp.int32, (1, 8, 128), 1)
    slab_lane = jax.lax.broadcasted_iota(jnp.int32, (1, 8, 128), 2)
    idx = slab_row * 128 + slab_lane
    out_ref[...] = jnp.where(idx == 0, sim_part,
                             jnp.where(idx == 1, sep_part,
                                       jnp.where(idx == 2, ce_part, 0.0)))


def _vmem_capacity_bytes():
    # Physical per-TensorCore VMEM (128 MiB on v5e/v6e, 64 MiB on v7x).
    try:
        return int(pltpu.get_tpu_info().vmem_capacity_bytes)
    except Exception:
        return 64 * 1024 * 1024   # conservative fallback (v7x per-core)


def _pick_tile_n(n_rows, d, c, p, feat_bytes, logits_bytes, vmem_budget):
    """Dtype- and intermediate-aware row-tile picker kept under the VMEM budget."""
    fixed = 2 * d * p * 4                                   # constant prototype block (x2 bufs)
    per_row = (2 * (d * feat_bytes + c * logits_bytes + 4)  # double-buffered input tiles
               + 4 * p * 4                                  # f32 [tn,P] temporaries
               + 4 * c * 4                                  # f32 [tn,C] temporaries
               + 16)                                        # [tn,1] scalars (valid/m2/lse/logz)
    avail = max(vmem_budget - fixed, 8 * per_row)
    cap = max(8, (avail // per_row // 8) * 8)
    # Fewer, bigger tiles where VMEM allows (v5e/v6e: 128 MiB physical); 512 cap on v7x.
    tile_cap = 1024 if vmem_budget >= (96 << 20) else 512
    # Never exceed the array along the row dim (8-aligned, or == n for tiny batches).
    row_cap = (n_rows // 8) * 8 if n_rows >= 8 else n_rows
    return int(max(min(8, n_rows), min(tile_cap, cap, row_cap)))


def itloss_jiasaw(features_front, logits, labels, text_prototype, num_class,
                  alpha=1.0, beta=1.0, jigsaw="True", tile_n=None):
    n, d = features_front.shape
    c_logits = logits.shape[1]
    p = text_prototype.shape[0]
    assert p == num_class - 1

    labels = labels.astype(jnp.int32)
    labels_2d = labels.reshape(n, 1)

    # Tiny wrapper glue: prototype L2-normalization (f32) + pre-transpose; pass in the
    # feature dtype so bf16 features get a native bf16 MXU matmul in the kernel.
    proto = text_prototype.astype(jnp.float32)
    proto = proto / jnp.linalg.norm(proto, axis=1, keepdims=True)
    proto_t = proto.T.astype(features_front.dtype)          # [D, P]

    feat_bytes = jnp.dtype(features_front.dtype).itemsize
    logits_bytes = jnp.dtype(logits.dtype).itemsize

    vmem_limit = int(min(_vmem_capacity_bytes() * 3 // 4, 100 * 1024 * 1024))
    if tile_n is None:
        tile_n = _pick_tile_n(n, d, c_logits, p, feat_bytes, logits_bytes, vmem_limit)
    num_tiles = pl.cdiv(n, tile_n)

    cost = pl.CostEstimate(
        flops=2 * n * d * p,
        transcendentals=n * (2 * p + c_logits),
        bytes_accessed=(n * (d * feat_bytes + c_logits * logits_bytes + 4)
                        + d * p * feat_bytes + num_tiles * 8 * 128 * 4),
    )

    kernel = functools.partial(_itloss_kernel, num_class=num_class,
                               n_rows=n, tile_n=tile_n)
    partials = pl.pallas_call(
        kernel,
        grid=(num_tiles,),
        in_specs=[
            pl.BlockSpec((tile_n, d), lambda i: (i, 0)),          # features (native dtype)
            pl.BlockSpec((d, p), lambda i: (0, 0)),               # prototypes.T (constant block)
            pl.BlockSpec((tile_n, c_logits), lambda i: (i, 0)),   # logits (native dtype)
            pl.BlockSpec((tile_n, 1), lambda i: (i, 0)),          # int32 labels
        ],
        out_specs=pl.BlockSpec((1, 8, 128), lambda i: (i, 0, 0)),
        out_shape=jax.ShapeDtypeStruct((num_tiles, 8, 128), jnp.float32),
        compiler_params=pltpu.CompilerParams(
            dimension_semantics=("parallel",),
            vmem_limit_bytes=vmem_limit),
        cost_estimate=cost,
    )(features_front, proto_t, logits, labels_2d)

    # --- final scalar reductions (glue): out-of-bounds rows contributed exactly 0 ---
    sums = jnp.sum(partials, axis=(0, 1))                    # (128,)
    sim_total, sep_total, ce_total = sums[0], sums[1], sums[2]

    simloss = -sim_total / n
    loss_ce = ce_total / n

    if jigsaw == "True":
        num = jnp.sum((labels == num_class).astype(jnp.float32))
        seploss = jnp.where(num > 0, sep_total / jnp.maximum(num, 1.0), 0.0)
    else:
        seploss = 0.0

    # Grid-invariant text-prototype term (P x P, tiny) hoisted out of the kernel.
    c = num_class - 1
    gram = proto @ proto.T
    textloss = jnp.log(jnp.sum(jnp.exp(gram) * (1.0 - jnp.eye(c, dtype=jnp.float32)))) / c

    return alpha * simloss + beta * loss_ce + textloss + seploss


def _ref_loss(features, logits, labels, prototypes_raw, num_class,
              alpha=1.0, beta=1.0, jigsaw="True"):
    # pure-JAX reference mirroring the PyTorch forward
    proto = prototypes_raw / jnp.linalg.norm(prototypes_raw, axis=1, keepdims=True)
    logp = jax.nn.log_softmax(logits, axis=1)
    loss_ce = -jnp.mean(jnp.take_along_axis(logp, labels[:, None], axis=1))
    p = num_class - 1
    mask = (labels[:, None] == jnp.arange(p)[None, :]).astype(jnp.float32)
    dots = features @ proto.T
    log_prob = jax.nn.log_softmax(dots / TEMPERATURE, axis=1)
    simloss = -jnp.mean(jnp.sum(mask * log_prob, axis=1))
    jig = (labels == num_class).astype(jnp.float32)
    if jigsaw != "True":
        jig = jnp.zeros_like(jig)
    lse = jax.scipy.special.logsumexp(dots, axis=1)
    num = jnp.sum(jig)
    seploss = jnp.where(num > 0, jnp.sum(jig * lse) / jnp.maximum(num, 1.0), 0.0)
    gram = proto @ proto.T
    textloss = jnp.log(jnp.sum(jnp.exp(gram) * (1.0 - jnp.eye(p)))) / p
    return alpha * simloss + beta * loss_ce + textloss + seploss


if __name__ == "__main__":
    key = jax.random.PRNGKey(0)
    num_class = 5
    P = num_class - 1          # number of text prototypes
    C = num_class + 1          # logits classes so label == num_class is valid for CE
    D = 32
    k1, k2, k3, k4, k5 = jax.random.split(key, 5)
    prototypes = jax.random.normal(k3, (P, D), dtype=jnp.float32)

    # case 1: batch divides the tile evenly
    N1 = 8
    feats1 = jax.random.normal(k1, (N1, D), dtype=jnp.float32)
    logits1 = jax.random.normal(k2, (N1, C), dtype=jnp.float32)
    labels1 = jnp.array([0, 1, 2, 3, num_class, 1, num_class, 2], dtype=jnp.int32)
    loss1 = jax.block_until_ready(
        itloss_jiasaw(feats1, logits1, labels1, prototypes, num_class,
                      alpha=1.0, beta=1.0, jigsaw="True"))
    ref1 = _ref_loss(feats1, logits1, labels1, prototypes, num_class)
    assert jnp.allclose(loss1, ref1, rtol=1e-4, atol=1e-4), (float(loss1), float(ref1))

    # case 2: ragged batch (exercises the in-kernel row-validity mask, no wrapper pad)
    N2 = 13
    feats2 = jax.random.normal(k4, (N2, D), dtype=jnp.float32)
    logits2 = jax.random.normal(k5, (N2, C), dtype=jnp.float32)
    labels2 = jnp.array([0, 1, 2, 3, num_class, 0, 1, 2, 3, num_class, 1, 2, 3],
                        dtype=jnp.int32)
    loss2 = jax.block_until_ready(
        itloss_jiasaw(feats2, logits2, labels2, prototypes, num_class,
                      alpha=1.0, beta=1.0, jigsaw="True"))
    ref2 = _ref_loss(feats2, logits2, labels2, prototypes, num_class)
    assert jnp.allclose(loss2, ref2, rtol=1e-4, atol=1e-4), (float(loss2), float(ref2))

    print("KERNEL_OK")
</pallas_src>

<mosaic_0001>
module attributes {stable_mosaic.version = 11 : i64} {
  func.func @_itloss_kernel(%arg0: i32, %arg1: memref<8x32xf32, #tpu.memory_space<vmem>>, %arg2: memref<32x4xf32, #tpu.memory_space<vmem>>, %arg3: memref<8x6xf32, #tpu.memory_space<vmem>>, %arg4: memref<8x1xi32, #tpu.memory_space<vmem>>, %arg5: memref<1x8x128xf32, #tpu.memory_space<vmem>>) attributes {dimension_semantics = [#tpu.dimension_semantics<parallel>], iteration_bounds = array<i64: 1>, scalar_prefetch = 0 : i64, scratch_operands = 0 : i64, tpu.core_type = #tpu.core_type<tc>, window_params = [{transform_indices = @transform_0, window_bounds = array<i64: 8, 32>}, {pipeline_mode = #tpu.pipeline_mode<synchronous>, transform_indices = @transform_1, window_bounds = array<i64: 32, 4>}, {transform_indices = @transform_2, window_bounds = array<i64: 8, 6>}, {transform_indices = @transform_3, window_bounds = array<i64: 8, 1>}, {transform_indices = @transform_4, window_bounds = array<i64: 1, 8, 128>}]} {
    %c0 = arith.constant 0 : index
    %c0_0 = arith.constant 0 : index
    %0 = vector.load %arg1[%c0, %c0_0] : memref<8x32xf32, #tpu.memory_space<vmem>>, vector<8x32xf32>
    %c0_1 = arith.constant 0 : index
    %c0_2 = arith.constant 0 : index
    %1 = vector.load %arg2[%c0_1, %c0_2] : memref<32x4xf32, #tpu.memory_space<vmem>>, vector<32x4xf32>
    %c0_3 = arith.constant 0 : index
    %c0_4 = arith.constant 0 : index
    %2 = vector.load %arg3[%c0_3, %c0_4] : memref<8x6xf32, #tpu.memory_space<vmem>>, vector<8x6xf32>
    %c0_5 = arith.constant 0 : index
    %c0_6 = arith.constant 0 : index
    %3 = vector.load %arg4[%c0_5, %c0_6] : memref<8x1xi32, #tpu.memory_space<vmem>>, vector<8x1xi32>
    %4 = tpu.iota {dimensions = array<i32: 0>} : vector<8x1xi32>
    %c8_i32 = arith.constant 8 : i32
    %5 = arith.muli %arg0, %c8_i32 : i32
    %6 = vector.broadcast %5 : i32 to vector<8x1xi32>
    %7 = arith.addi %6, %4 : vector<8x1xi32>
    %c8_i32_7 = arith.constant 8 : i32
    %8 = vector.broadcast %c8_i32_7 : i32 to vector<8x1xi32>
    %9 = arith.cmpi slt, %7, %8 : vector<8x1xi32>
    %cst = arith.constant dense<0.000000e+00> : vector<8x4xf32>
    %10 = tpu.matmul %0, %1, %cst {dimension_numbers = #tpu.dot_dimension_numbers<[1], [0], [0], [1], [0, 0, 1, 1], [], []>} : vector<8x32xf32>, vector<32x4xf32>, vector<8x4xf32> -> vector<8x4xf32>
    %cst_8 = arith.constant 0.000000e+00 : f32
    %11 = vector.shape_cast %9 : vector<8x1xi1> to vector<8x1xi1>
    %12 = vector.broadcast %11 : vector<8x1xi1> to vector<8x4xi1>
    %13 = vector.broadcast %cst_8 : f32 to vector<8x4xf32>
    %14 = arith.select %12, %10, %13 : vector<8x4xi1>, vector<8x4xf32>
    %cst_9 = arith.constant 0.000000e+00 : f32
    %15 = vector.shape_cast %9 : vector<8x1xi1> to vector<8x1xi1>
    %16 = vector.broadcast %15 : vector<8x1xi1> to vector<8x6xi1>
    %17 = vector.broadcast %cst_9 : f32 to vector<8x6xf32>
    %18 = arith.select %16, %2, %17 : vector<8x6xi1>, vector<8x6xf32>
    %cst_10 = arith.constant dense<0xFF800000> : vector<8xf32>
    %19 = vector.multi_reduction <maximumf>, %14, %cst_10 [1] : vector<8x4xf32> to vector<8xf32>
    %20 = vector.shape_cast %19 : vector<8xf32> to vector<8x1xf32>
    %21 = vector.broadcast %20 : vector<8x1xf32> to vector<8x4xf32>
    %22 = arith.subf %14, %21 : vector<8x4xf32>
    %cst_11 = arith.constant 1.000000e+01 : f32
    %23 = vector.broadcast %cst_11 : f32 to vector<8x4xf32>
    %24 = arith.mulf %22, %23 : vector<8x4xf32>
    %25 = math.exp %24 : vector<8x4xf32>
    %cst_12 = arith.constant dense<0.000000e+00> : vector<8xf32>
    %26 = vector.multi_reduction <add>, %25, %cst_12 [1] : vector<8x4xf32> to vector<8xf32>
    %27 = vector.shape_cast %26 : vector<8xf32> to vector<8x1xf32>
    %28 = math.log %27 : vector<8x1xf32>
    %29 = vector.broadcast %28 : vector<8x1xf32> to vector<8x4xf32>
    %30 = arith.subf %24, %29 : vector<8x4xf32>
    %31 = tpu.iota {dimensions = array<i32: 1>} : vector<8x4xi32>
    %32 = vector.broadcast %3 : vector<8x1xi32> to vector<8x4xi32>
    %33 = arith.cmpi eq, %32, %31 : vector<8x4xi32>
    %34 = vector.broadcast %9 : vector<8x1xi1> to vector<8x4xi1>
    %35 = arith.andi %34, %33 : vector<8x4xi1>
    %cst_13 = arith.constant 0.000000e+00 : f32
    %36 = vector.broadcast %cst_13 : f32 to vector<8x4xf32>
    %37 = arith.select %35, %30, %36 : vector<8x4xi1>, vector<8x4xf32>
    %38 = vector.shape_cast %37 : vector<8x4xf32> to vector<1x8x4xf32>
    %cst_14 = arith.constant dense<0.000000e+00> : vector<1xf32>
    %39 = vector.multi_reduction <add>, %38, %cst_14 [1, 2] : vector<1x8x4xf32> to vector<1xf32>
    %40 = vector.shape_cast %39 : vector<1xf32> to vector<1x1x1xf32>
    %41 = vector.extract %40[0, 0, 0] : f32 from vector<1x1x1xf32>
    %42 = vector.broadcast %20 : vector<8x1xf32> to vector<8x4xf32>
    %43 = arith.subf %14, %42 : vector<8x4xf32>
    %44 = math.exp %43 : vector<8x4xf32>
    %cst_15 = arith.constant dense<0.000000e+00> : vector<8xf32>
    %45 = vector.multi_reduction <add>, %44, %cst_15 [1] : vector<8x4xf32> to vector<8xf32>
    %46 = vector.shape_cast %45 : vector<8xf32> to vector<8x1xf32>
    %47 = math.log %46 : vector<8x1xf32>
    %48 = arith.addf %47, %20 : vector<8x1xf32>
    %c5_i32 = arith.constant 5 : i32
    %49 = vector.broadcast %c5_i32 : i32 to vector<8x1xi32>
    %50 = arith.cmpi eq, %3, %49 : vector<8x1xi32>
    %51 = arith.andi %9, %50 : vector<8x1xi1>
    %cst_16 = arith.constant 0.000000e+00 : f32
    %52 = vector.broadcast %cst_16 : f32 to vector<8x1xf32>
    %53 = arith.select %51, %48, %52 : vector<8x1xi1>, vector<8x1xf32>
    %54 = vector.shape_cast %53 : vector<8x1xf32> to vector<1x8x1xf32>
    %cst_17 = arith.constant dense<0.000000e+00> : vector<1xf32>
    %55 = vector.multi_reduction <add>, %54, %cst_17 [1, 2] : vector<1x8x1xf32> to vector<1xf32>
    %56 = vector.shape_cast %55 : vector<1xf32> to vector<1x1x1xf32>
    %57 = vector.extract %56[0, 0, 0] : f32 from vector<1x1x1xf32>
    %cst_18 = arith.constant dense<0xFF800000> : vector<8xf32>
    %58 = vector.multi_reduction <maximumf>, %18, %cst_18 [1] : vector<8x6xf32> to vector<8xf32>
    %59 = vector.shape_cast %58 : vector<8xf32> to vector<8x1xf32>
    %60 = vector.broadcast %59 : vector<8x1xf32> to vector<8x6xf32>
    %61 = arith.subf %18, %60 : vector<8x6xf32>
    %62 = math.exp %61 : vector<8x6xf32>
    %cst_19 = arith.constant dense<0.000000e+00> : vector<8xf32>
    %63 = vector.multi_reduction <add>, %62, %cst_19 [1] : vector<8x6xf32> to vector<8xf32>
    %64 = vector.shape_cast %63 : vector<8xf32> to vector<8x1xf32>
    %65 = math.log %64 : vector<8x1xf32>
    %66 = tpu.iota {dimensions = array<i32: 1>} : vector<8x6xi32>
    %67 = vector.broadcast %3 : vector<8x1xi32> to vector<8x6xi32>
    %68 = arith.cmpi eq, %67, %66 : vector<8x6xi32>
    %69 = vector.broadcast %9 : vector<8x1xi1> to vector<8x6xi1>
    %70 = arith.andi %69, %68 : vector<8x6xi1>
    %71 = vector.broadcast %65 : vector<8x1xf32> to vector<8x6xf32>
    %72 = arith.subf %61, %71 : vector<8x6xf32>
    %cst_20 = arith.constant 0.000000e+00 : f32
    %73 = vector.broadcast %cst_20 : f32 to vector<8x6xf32>
    %74 = arith.select %70, %72, %73 : vector<8x6xi1>, vector<8x6xf32>
    %75 = vector.shape_cast %74 : vector<8x6xf32> to vector<1x8x6xf32>
    %cst_21 = arith.constant dense<0.000000e+00> : vector<1xf32>
    %76 = vector.multi_reduction <add>, %75, %cst_21 [1, 2] : vector<1x8x6xf32> to vector<1xf32>
    %77 = vector.shape_cast %76 : vector<1xf32> to vector<1x1x1xf32>
    %78 = vector.extract %77[0, 0, 0] : f32 from vector<1x1x1xf32>
    %cst_22 = arith.constant 0.000000e+00 : f32
    %79 = arith.subf %cst_22, %78 : f32
    %80 = tpu.iota {dimensions = array<i32: 1>} : vector<1x8x128xi32>
    %81 = tpu.iota {dimensions = array<i32: 2>} : vector<1x8x128xi32>
    %c128_i32 = arith.constant 128 : i32
    %82 = vector.broadcast %c128_i32 : i32 to vector<1x8x128xi32>
    %83 = arith.muli %80, %82 : vector<1x8x128xi32>
    %84 = arith.addi %83, %81 : vector<1x8x128xi32>
    %c0_i32 = arith.constant 0 : i32
    %85 = vector.broadcast %c0_i32 : i32 to vector<1x8x128xi32>
    %86 = arith.cmpi eq, %84, %85 : vector<1x8x128xi32>
    %c1_i32 = arith.constant 1 : i32
    %87 = vector.broadcast %c1_i32 : i32 to vector<1x8x128xi32>
    %88 = arith.cmpi eq, %84, %87 : vector<1x8x128xi32>
    %c2_i32 = arith.constant 2 : i32
    %89 = vector.broadcast %c2_i32 : i32 to vector<1x8x128xi32>
    %90 = arith.cmpi eq, %84, %89 : vector<1x8x128xi32>
    %cst_23 = arith.constant 0.000000e+00 : f32
    %91 = vector.broadcast %79 : f32 to vector<1x8x128xf32>
    %92 = vector.broadcast %cst_23 : f32 to vector<1x8x128xf32>
    %93 = arith.select %90, %91, %92 : vector<1x8x128xi1>, vector<1x8x128xf32>
    %94 = vector.broadcast %57 : f32 to vector<1x8x128xf32>
    %95 = arith.select %88, %94, %93 : vector<1x8x128xi1>, vector<1x8x128xf32>
    %96 = vector.broadcast %41 : f32 to vector<1x8x128xf32>
    %97 = arith.select %86, %96, %95 : vector<1x8x128xi1>, vector<1x8x128xf32>
    %c0_24 = arith.constant 0 : index
    %c0_25 = arith.constant 0 : index
    %c0_26 = arith.constant 0 : index
    %98 = vector.load %arg5[%c0_24, %c0_25, %c0_26] : memref<1x8x128xf32, #tpu.memory_space<vmem>>, vector<1x8x128xf32>
    tpu.vector_store %arg5[%c0_24, %c0_25, %c0_26], %97 {strides = array<i32>} : memref<1x8x128xf32, #tpu.memory_space<vmem>>, vector<1x8x128xf32>,
    return
  }
  func.func @transform_0(%arg0: i32) -> (i32, i32) {
    %c0_i32 = arith.constant 0 : i32
    %c0_i32_0 = arith.constant 0 : i32
    return %arg0, %c0_i32 : i32, i32
  }
  func.func @transform_1(%arg0: i32) -> (i32, i32) {
    %c0_i32 = arith.constant 0 : i32
    %c0_i32_0 = arith.constant 0 : i32
    %c0_i32_1 = arith.constant 0 : i32
    return %c0_i32, %c0_i32_0 : i32, i32
  }
  func.func @transform_2(%arg0: i32) -> (i32, i32) {
    %c0_i32 = arith.constant 0 : i32
    %c0_i32_0 = arith.constant 0 : i32
    return %arg0, %c0_i32 : i32, i32
  }
  func.func @transform_3(%arg0: i32) -> (i32, i32) {
    %c0_i32 = arith.constant 0 : i32
    %c0_i32_0 = arith.constant 0 : i32
    return %arg0, %c0_i32 : i32, i32
  }
  func.func @transform_4(%arg0: i32) -> (i32, i32, i32) {
    %c0_i32 = arith.constant 0 : i32
    %c0_i32_0 = arith.constant 0 : i32
    %c0_i32_1 = arith.constant 0 : i32
    return %arg0, %c0_i32, %c0_i32_0 : i32, i32, i32
  }
}

</mosaic_0001>

<bundles_post_ra>
// kernel: tpu_custom_call.1
= control target key start
LH: loop header
LB: loop body
LE: loop exit
PB: predicated region body
PF: predicated region fallthrough
CT: control target
= control target key end

     0   :  { %v277_v1 = vmov 0.0   ;;  %vm278_vm0 = vmmov 0   ;;  %s337_s0 = inlined_call_operand.vmem [shape: f32[8,32], index: 0, kind: input, shape index: {}]   ;;  %s338_s1 = inlined_call_operand.vmem [shape: f32[32,4], index: 1, kind: input, shape index: {}]   ;;  %s339_s2 = inlined_call_operand.vmem [shape: f32[8,6], index: 2, kind: input, shape index: {}]   ;;  %s340_s3 = inlined_call_operand.vmem [shape: s32[8,1], index: 3, kind: input, shape index: {}]   ;;  %s341_s4 = inlined_call_operand.hbm [shape: f32[1,8,128], index: 4, kind: output, shape index: {}]  }
   0x1   :  { %v22_v0 = vld [vmem:[%s338_s1 + $0x18] sm:$0xff]  ;;  %220 = vmatprep.subr.mxu0 %v277_v1  ;;  %v21_v2 = vld [vmem:[%s338_s1 + $0x10] sm:$0xff]  ;;  %228 = vmatprep.mubr.msk.f32.mxu0 %vm278_vm0, %v277_v1 }
   0x2   :  { %9 = vsyncpa [#allocation3], 0  ;;  %221 = vmatpush3.msra.mxu0 %v22_v0  ;;  %v20_v3 = vld [vmem:[%s338_s1 + $0x8] sm:$0xff]  ;;  %v19_v4 = vld [vmem:[%s338_s1] sm:$0xff]  ;;  %vm31_vm1 = vcmask 261120   ;;  %vm109_vm2 = vcmask 31744   ;;  %v25_v30 = vlaneseq }
   0x3   :  { %222 = vmatprep.subr.mxu0 %v277_v1  ;;  %v18_v5 = vld [vmem:[%s337_s0] sm:$0xff]  ;;  %vm163_vm3 = vcmask 48128   ;;  %v279_v11 = vmov 0   ;;  %vm152_vm5 = vcmask 7168   ;;  %s280_s29 = smov [#allocation2]  }
   0x4   :  { %223 = vmatpush3.msra.mxu0 %v21_v2  ;;  %v23_v7 = vld [vmem:[%s339_s2] sm:$0xff]  ;;  %241 = vset.pattern.permute.xlu1 %v279_v11  ;;  %v124_v33 = vand.u32 127, %v25_v30  ;;  %s206_s30 = sshll.u32 %s280_s29, 4  ;;  %s207_s30 = int_to_ptr.vmem [resolvable:$true] %s206_s30 }
   0x5   :  { %224 = vmatprep.subr.mxu0 %v277_v1  ;;  %v164_v10 = vsel %vm163_vm3, %v23_v7, -inf  ;;  %242 = vset.pattern.permute.xlu0 %v279_v11  ;;  %v24_v26 = vld [vmem:[%s340_s3] sm:$0xff]  ;;  %s255_s5 = scalar_lea.vmem %s207_s30, 128  ;;  %p260_p1 = scmp.lt.s32.totalorder %s207_s30, %s207_s30 }
   0x6   :  { %225 = vmatpush3.msra.mxu0 %v20_v3  ;;  %vm149_vm4 = vcmp.eq.s32.totalorder %v24_v26, 5  ;;  %p256_p0 = scmp.ne.s32.totalorder %s207_s30, %s255_s5  ;;  %p261_p2 = scmp.lt.s32.totalorder %s255_s5, %s255_s5 }
   0x7   :  { %226 = vmatprep.subr.mxu0 %v277_v1 }
   0x8   :  { %227 = vmatpush3.msra.mxu0 %v19_v4  ;;  %p262_p3 = por %p261_p2, %p260_p1 }
   0x9   :  { %229 = vmatmul.mubr.msk.f32.vlgmr.msra.gmra.mxu0 %vm31_vm1, %v18_v5  ;;  %v26_v5 = vshrl.u32 %v25_v30, 7 }
   0xa   :  { %p263_p4 = pnand %p262_p3, %p256_p0 }
  0xc9   :  { %v101_v6 = vpop.f32.mrf.mxu0 }
  0xca   :  { %v110_v8 = vsel %vm109_vm2, %v101_v6, -inf }
  0xcb   :  { %111 = vmax.xlane.f32.xlu0 %v110_v8  ;;  %v230_v9 = vpop.f32.mrf.mxu0 }
  0xcf   :  { %165 = vmax.xlane.f32.xlu0 %v164_v10 }
 0x154   :  { %v112_v12 = vpop.xlane.xlu0 %111 }
 0x155   :  { %v113_v13 = vsub.f32 %v101_v6, %v112_v12  ;;  %v188_v6 = vmul.u32 128, %v26_v5 }
 0x157   :  { %v114_v14 = vmul.f32 10.0, %v113_v13  ;;  %v141_v15 = vmul.f32 1.442695, %v113_v13 }
 0x158   :  { %v166_v16 = vpop.xlane.xlu0 %165 }
 0x159   :  { %v115_v17 = vmul.f32 1.442695, %v114_v14  ;;  %243 = vpow2.f32 %v141_v15  ;;  %v167_v18 = vsub.f32 %v23_v7, %v166_v16  ;;  %v189_v7 = vadd.s32 %v188_v6, %v124_v33 }
 0x15b   :  { %245 = vpow2.f32 %v115_v17  ;;  %v168_v19 = vmul.f32 1.442695, %v167_v18  ;;  %vm192_vm7 = vcmp.eq.s32.totalorder %v189_v7, 2  ;;  %vm191_vm8 = vcmp.eq.s32.totalorder %v189_v7, 1 }
 0x15c   :  { %vm190_vm9 = vcmp.eq.s32.totalorder %v189_v7, 0 }
 0x15d   :  { %247 = vpow2.f32 %v168_v19 }
 0x166   :  { %v244_v20 = vpop.eup %243 }
 0x167   :  { %v143_v21 = vsel %vm109_vm2, %v244_v20, 0.0 }
 0x168   :  { %v246_v22 = vpop.eup %245  ;;  %144 = vadd.xlane.f32.xlu1 %v143_v21 }
 0x169   :  { %v117_v24 = vsel %vm109_vm2, %v246_v22, 0.0 }
 0x16a   :  { %v248_v23 = vpop.eup %247 }
 0x16b   :  { %v170_v25 = vsel %vm163_vm3, %v248_v23, 0.0 }
 0x16c   :  { %118 = vadd.xlane.f32.xlu1 %v117_v24  ;;  %171 = vadd.xlane.f32.xlu0 %v170_v25 }
 0x17d   :  { %126 = vperm.xlu1 %241, %v24_v26  }
 0x1f1   :  { %v145_v27 = vpop.xlane.xlu1 %144 }
 0x1f2   :  { %249 = vlog2.f32 %v145_v27 }
 0x1f5   :  { %v119_v28 = vpop.xlane.xlu1 %118  ;;  %v172_v29 = vpop.xlane.xlu0 %171 }
 0x1f6   :  { %251 = vlog2.f32 %v119_v28 }
 0x1f7   :  { %253 = vlog2.f32 %v172_v29 }
 0x1f9   :  { %v127_v34 = vpop.permute.xlu1 %126 }
 0x1fa   :  { %vm128_vm6 = vcmp.eq.s32.totalorder %v127_v34, %v124_v33 }
 0x1ff   :  { %v250_v31 = vpop.eup %249 }
 0x200   :  { %v147_v32 = vmul.f32 0.6931472, %v250_v31 }
 0x202   :  { %v148_v35 = vadd.f32 %v147_v32, %v112_v12 }
 0x203   :  { %v252_v36 = vpop.eup %251 }
 0x204   :  { %v254_v37 = vpop.eup %253  ;;  %v121_v38 = vmul.f32 0.6931472, %v252_v36  ;;  %v151_v39 = vsel %vm149_vm4, %v148_v35, 0.0 }
 0x205   :  { %v174_v40 = vmul.f32 0.6931472, %v254_v37  ;;  %v153_v41 = vsel %vm152_vm5, %v151_v39, 0.0 }
 0x206   :  { %154 = vadd.xlane.f32.xlu0 %v153_v41  ;;  %v122_v42 = vsub.f32 %v114_v14, %v121_v38 }
 0x207   :  { %v175_v43 = vsub.f32 %v167_v18, %v174_v40 }
 0x208   :  { %v130_v44 = vsel %vm128_vm6, %v122_v42, 0.0 }
 0x209   :  { %v131_v45 = vsel %vm109_vm2, %v130_v44, 0.0  ;;  %v176_v46 = vsel %vm128_vm6, %v175_v43, 0.0 }
 0x20a   :  { %132 = vadd.xlane.f32.xlu0 %v131_v45  ;;  %v177_v47 = vsel %vm163_vm3, %v176_v46, 0.0 }
 0x20e   :  { %178 = vadd.xlane.f32.xlu0 %v177_v47 }
 0x28f   :  { %v155_v48 = vpop.xlane.xlu0 %154 }
 0x290   :  { %v156_v49 = vrot.slane %v155_v48, 4 }
 0x292   :  { %v157_v50 = vadd.f32 %v156_v49, %v155_v48 }
 0x293   :  { %v133_v51 = vpop.xlane.xlu0 %132 }
 0x294   :  { %v158_v52 = vrot.slane %v157_v50, 2  ;;  %v134_v53 = vrot.slane %v133_v51, 4 }
 0x296   :  { %v135_v54 = vadd.f32 %v134_v53, %v133_v51  ;;  %v159_v56 = vadd.f32 %v158_v52, %v157_v50 }
 0x297   :  { %v179_v55 = vpop.xlane.xlu0 %178 }
 0x298   :  { %v136_v57 = vrot.slane %v135_v54, 2  ;;  %v180_v58 = vrot.slane %v179_v55, 4  ;;  %v160_v61 = vrot.slane %v159_v56, 1 }
 0x29a   :  { %v181_v59 = vadd.f32 %v180_v58, %v179_v55  ;;  %v137_v60 = vadd.f32 %v136_v57, %v135_v54  ;;  %v161_v2 = vadd.f32 %v160_v61, %v159_v56 }
 0x29c   :  { %v182_v62 = vrot.slane %v181_v59, 2  ;;  %v138_v63 = vrot.slane %v137_v60, 1 }
 0x29e   :  { %v183_v0 = vadd.f32 %v182_v62, %v181_v59  ;;  %v139_v1 = vadd.f32 %v138_v63, %v137_v60 }
 0x2a0   :  { %231 = vpush %v139_v1  ;;  %v184_v3 = vrot.slane %v183_v0, 1 }
 0x2a1   :  { %233 = vpush %v161_v2 }
 0x2a2   :  { %v185_v4 = vadd.f32 %v184_v3, %v183_v0 }
 0x2a4   :  { %235 = vpush %v185_v4 }
 0x2d1   :  { %s232_s2 = spop %231 }
 0x2d2   :  { %s234_s3 = spop %233  ;;  %v197_v11 = vstv %s232_s2 }
 0x2d3   :  { %v195_v9 = vstv %s234_s3 }
 0x2d5   :  { %s236_s27 = spop %235 }
 0x2d6   :  { %s187_s28 = ssub.f32 0.0, %s236_s27 }
 0x2d8   :  { %v193_v8 = vstv %s187_s28 }
 0x2d9   :  { %v194_v10 = vsel %vm192_vm7, %v193_v8, 0.0 }
 0x2da   :  { %v196_v12 = vsel %vm191_vm8, %v195_v9, %v194_v10 }
 0x2db   :  { %v198_v13 = vsel %vm190_vm9, %v197_v11, %v196_v12 }
 0x2dc   :  { %199 = vst [vmem:[#allocation2] sm:$0xff] %v198_v13 }
 0x2dd   :  { %266 = shalt.err (!%p263_p4)
}
 0x2de   :  { %209 = dma.vmem_to_hbm [thread:$0]  %s207_s30, 128, %s341_s4, [#allocation3]  }
 0x2df   :  { %275 = dma.done.wait [#allocation3], 128  }
 0x2e0   :  { %276 = vsyncadd [#allocation3], 4294967168 }
 0x2e1   :  { %213 = vsyncpa [#allocation3], 1 }

</bundles_post_ra>
